<compile_context>
chip_gen: v7x
topology: tpu7x:2x2x1
jax: 0.10.0
libtpu: 0.0.40
codegen_flags: <defaults>
</compile_context>

<pallas_src>
import functools

import jax
import jax.numpy as jnp
from jax.experimental import pallas as pl
from jax.experimental.pallas import tpu as pltpu

_VMEM_LIMIT = 32 * 1024 * 1024  # fits v5e/v6e/v7x scoped-VMEM budgets comfortably


def _round_up(x, m):
    return ((x + m - 1) // m) * m


def _tile(size, tile, align):
    """Pick an effective tile <= `tile`, aligned to `align`; return (t, n, padded)."""
    t = min(tile, _round_up(size, align))
    n = pl.cdiv(size, t)
    return t, n, n * t


# --------------------------------------------------------------------------- #
# Pallas kernels
# --------------------------------------------------------------------------- #
def _act_matmul_kernel(p_ref, w_ref, *rest, act, with_stats):
    """Fused activation + tiled matmul with an f32 VMEM accumulator.

    grid = (G, M_tiles, K_tiles); K (reduction) is innermost / "arbitrary".
    Optionally emits per-(G, M-tile) channel sum / sum-of-squares so BatchNorm
    statistics can be formed without a whole-array block (two-pass BN).
    """
    if with_stats:
        o_ref, sum_ref, ssq_ref, acc_ref = rest
    else:
        o_ref, acc_ref = rest
        sum_ref = ssq_ref = None

    k = pl.program_id(2)

    @pl.when(k == 0)
    def _init():
        acc_ref[...] = jnp.zeros_like(acc_ref)

    p = p_ref[0]                                    # (tm, tk) bf16
    if act == "leaky_relu":
        p = jnp.where(p > 0, p, 0.2 * p)            # LeakyReLU(0.2)
    elif act == "relu":
        p = jnp.maximum(p, 0)                       # ReLU
    # bf16 x bf16 -> f32 accumulation on the MXU (native rate, no f32 emulation).
    acc_ref[...] += jnp.dot(p, w_ref[0], preferred_element_type=jnp.float32)

    @pl.when(k == pl.num_programs(2) - 1)
    def _finalize():
        y = acc_ref[...]
        o_ref[0] = y.astype(o_ref.dtype)
        if with_stats:
            # Per-channel partial sums (zero-padded rows/cols contribute 0).
            sum_ref[0, 0] = jnp.sum(y, axis=0, keepdims=True)
            ssq_ref[0, 0] = jnp.sum(y * y, axis=0, keepdims=True)


def _bn_apply_kernel(y_ref, mean_ref, var_ref, gamma_ref, beta_ref, o_ref):
    """BatchNorm2d apply (batch statistics): (y - mean) * rsqrt(var+eps) * g + b."""
    scale = gamma_ref[...] * jax.lax.rsqrt(var_ref[...] + 1e-5)   # EUP rsqrt
    shift = beta_ref[...] - mean_ref[...] * scale
    o_ref[0] = (y_ref[0] * scale + shift).astype(o_ref.dtype)


# --------------------------------------------------------------------------- #
# pallas_call wrappers
# --------------------------------------------------------------------------- #
def _act_matmul(patches, weights, n_out, *, act, with_stats, out_dtype,
                tm=512, tk=512):
    """patches: (G, M, K); weights: (G, K, n_out).  Returns padded outputs.

    Pads M to a tile multiple (align 8), K to a tile multiple (align 128), and
    output channels to a multiple of 128 (lane-dense stores, full MXU N dim).
    """
    G, M, K = patches.shape
    Np = _round_up(n_out, 128)
    tm_e, nm, M_pad = _tile(M, tm, 8)
    tk_e, nk, K_pad = _tile(K, tk, 128)

    p = jnp.pad(patches.astype(jnp.bfloat16),
                ((0, 0), (0, M_pad - M), (0, K_pad - K)))
    w = jnp.pad(weights.astype(jnp.bfloat16),
                ((0, 0), (0, K_pad - K), (0, Np - n_out)))

    out_shape = [jax.ShapeDtypeStruct((G, M_pad, Np), out_dtype)]
    out_specs = [pl.BlockSpec((1, tm_e, Np), lambda g, m, k: (g, m, 0))]
    if with_stats:
        for _ in range(2):  # channel sum, channel sum-of-squares
            out_shape.append(jax.ShapeDtypeStruct((G, nm, 1, Np), jnp.float32))
            out_specs.append(
                pl.BlockSpec((1, 1, 1, Np), lambda g, m, k: (g, m, 0, 0)))

    outs = pl.pallas_call(
        functools.partial(_act_matmul_kernel, act=act, with_stats=with_stats),
        out_shape=tuple(out_shape),
        grid=(G, nm, nk),
        in_specs=[
            pl.BlockSpec((1, tm_e, tk_e), lambda g, m, k: (g, m, k)),
            # weight block index is independent of m (re-used across M tiles)
            pl.BlockSpec((1, tk_e, Np), lambda g, m, k: (g, k, 0)),
        ],
        out_specs=tuple(out_specs),
        scratch_shapes=[pltpu.VMEM((tm_e, Np), jnp.float32)],
        compiler_params=pltpu.CompilerParams(
            dimension_semantics=("parallel", "parallel", "arbitrary"),
            vmem_limit_bytes=_VMEM_LIMIT),
    )(p, w)
    return outs, tm_e


def _bn_apply(y, mean, var, gamma, beta, tm_e):
    """Elementwise BN apply over the padded (G, M_pad, Np) conv output."""
    G, M_pad, Np = y.shape
    nm = M_pad // tm_e
    params = []
    for a in (mean, var, gamma, beta):
        a = a.astype(jnp.float32)
        a = jnp.pad(a, (0, Np - a.shape[0]))
        params.append(a.reshape(1, Np))

    return pl.pallas_call(
        _bn_apply_kernel,
        out_shape=jax.ShapeDtypeStruct((G, M_pad, Np), jnp.float32),
        grid=(G, nm),
        in_specs=[pl.BlockSpec((1, tm_e, Np), lambda g, m: (g, m, 0))]
                 + [pl.BlockSpec((1, Np), lambda g, m: (0, 0))] * 4,
        out_specs=pl.BlockSpec((1, tm_e, Np), lambda g, m: (g, m, 0)),
        compiler_params=pltpu.CompilerParams(
            dimension_semantics=("parallel", "parallel"),
            vmem_limit_bytes=_VMEM_LIMIT),
    )(y, *params)


# --------------------------------------------------------------------------- #
# JAX glue: im2col and the full forward pass
# --------------------------------------------------------------------------- #
def _im2col(x_nhwc, k, stride, pad):
    """(N, H, W, C) -> (N*Ho*Wo, k*k*C); columns ordered (kh, kw, c)."""
    x = jnp.pad(x_nhwc, ((0, 0), (pad, pad), (pad, pad), (0, 0)))
    N, Hp, Wp, C = x.shape
    Ho = (Hp - k) // stride + 1
    Wo = (Wp - k) // stride + 1
    cols = []
    for kh in range(k):
        for kw in range(k):
            cols.append(x[:, kh:kh + stride * Ho:stride,
                          kw:kw + stride * Wo:stride, :])
    patches = jnp.stack(cols, axis=3)                 # (N, Ho, Wo, k*k, C)
    return patches.reshape(N * Ho * Wo, k * k * C), Ho, Wo


def unet_innermost_forward(x_nchw, w_down, w_up, gamma, beta, *, tm=512, tk=512):
    """x_nchw: (N, input_nc, H, W) -> (N, input_nc + outer_nc, H, W)."""
    N, Cin, H, W = x_nchw.shape
    inner_nc = w_down.shape[0]
    outer_nc = w_up.shape[1]
    x_nhwc = jnp.transpose(x_nchw, (0, 2, 3, 1))

    # ---- down path: LeakyReLU(0.2) + Conv2d(k=4, s=2, p=1, bias=False) -----
    # TODO(synk): patch extraction is JAX-side glue (kept in bf16); an in-kernel
    # tap loop over the raw NHWC tensor would cut the remaining HBM expansion.
    p1, Ho, Wo = _im2col(x_nhwc.astype(jnp.bfloat16), k=4, stride=2, pad=1)
    w1 = jnp.transpose(w_down, (2, 3, 1, 0)).reshape(16 * Cin, inner_nc)
    outs, _ = _act_matmul(p1[None], w1[None], inner_nc, act="leaky_relu",
                          with_stats=False, out_dtype=jnp.bfloat16, tm=tm, tk=tk)
    M1 = N * Ho * Wo
    h1 = outs[0][0, :M1, :inner_nc].reshape(N, Ho, Wo, inner_nc)   # bf16

    # ---- up path: ReLU + ConvTranspose2d(k=4, s=2, p=1, bias=False) + BN ---
    # Phase decomposition: out[:, 2j+p, 2i+q, :] only touches 4 of the 16 taps.
    h1p = jnp.pad(h1, ((0, 0), (1, 1), (1, 1), (0, 0)))
    wf = jnp.transpose(w_up[:, :, ::-1, ::-1], (2, 3, 0, 1))   # (kh, kw, cin, cout)
    taps = {0: ((0, -1), (2, 0)), 1: ((1, 0), (3, 1))}         # phase -> ((tap, shift),)
    patch_phases, w_phases = [], []
    for ph in (0, 1):
        for pw in (0, 1):
            cols, wcols = [], []
            for kh, dh in taps[ph]:
                for kw, dw in taps[pw]:
                    cols.append(h1p[:, 1 + dh:1 + dh + Ho, 1 + dw:1 + dw + Wo, :])
                    wcols.append(wf[kh, kw])                   # (inner, outer)
            patch_phases.append(
                jnp.stack(cols, axis=3).reshape(M1, 4 * inner_nc))
            w_phases.append(jnp.concatenate(wcols, axis=0))
    p2 = jnp.stack(patch_phases, axis=0)                       # (4, M1, 4*inner) bf16
    w2 = jnp.stack(w_phases, axis=0)                           # (4, 4*inner, outer)

    outs, tm2 = _act_matmul(p2, w2, outer_nc, act="relu", with_stats=True,
                            out_dtype=jnp.float32, tm=tm, tk=tk)
    y_pad, s_part, ss_part = outs[0], outs[1], outs[2]

    # BatchNorm2d training-mode statistics over (N, H_out, W_out) == all rows of
    # all 4 phases; zero-padded rows/channels contribute nothing to the sums.
    count = float(4 * M1)
    s_tot = jnp.sum(s_part, axis=(0, 1, 2))                    # (Np,)
    ss_tot = jnp.sum(ss_part, axis=(0, 1, 2))                  # (Np,)
    mean = s_tot / count
    var = jnp.maximum(ss_tot / count - mean * mean, 0.0)       # biased variance
    # TODO(synk): running_mean / running_var buffer updates are not materialized.

    bn = _bn_apply(y_pad, mean, var, gamma, beta, tm2)         # (4, M_pad, Np)
    bn = bn[:, :M1, :outer_nc].reshape(2, 2, N, Ho, Wo, outer_nc)
    up = jnp.transpose(bn, (2, 3, 0, 4, 1, 5)).reshape(N, 2 * Ho, 2 * Wo, outer_nc)
    up_nchw = jnp.transpose(up, (0, 3, 1, 2)).astype(x_nchw.dtype)

    # ---- skip connection: torch.cat([x, model(x)], dim=1) ------------------
    return jnp.concatenate([x_nchw, up_nchw], axis=1)


# --------------------------------------------------------------------------- #
# Pure-JAX reference (same bf16-operand / f32-accumulate math) for the check
# --------------------------------------------------------------------------- #
def reference_forward(x, w_down, w_up, gamma, beta):
    xb = x.astype(jnp.bfloat16)
    l = jnp.where(xb > 0, xb, 0.2 * xb)
    d = jax.lax.conv_general_dilated(
        l, w_down.astype(jnp.bfloat16), window_strides=(2, 2),
        padding=((1, 1), (1, 1)), dimension_numbers=('NCHW', 'OIHW', 'NCHW'),
        preferred_element_type=jnp.float32)
    r = jnp.maximum(d.astype(jnp.bfloat16), 0)
    w_t = jnp.transpose(w_up[:, :, ::-1, ::-1], (1, 0, 2, 3)).astype(jnp.bfloat16)
    u = jax.lax.conv_general_dilated(
        r, w_t, window_strides=(1, 1), padding=((2, 2), (2, 2)),
        lhs_dilation=(2, 2), dimension_numbers=('NCHW', 'OIHW', 'NCHW'),
        preferred_element_type=jnp.float32)
    mean = jnp.mean(u, axis=(0, 2, 3), keepdims=True)
    var = jnp.mean((u - mean) ** 2, axis=(0, 2, 3), keepdims=True)
    bn = (u - mean) * jax.lax.rsqrt(var + 1e-5) * gamma.reshape(1, -1, 1, 1) \
        + beta.reshape(1, -1, 1, 1)
    return jnp.concatenate([x, bn], axis=1)


if __name__ == "__main__":
    key = jax.random.PRNGKey(0)
    k1, k2, k3, k4, k5 = jax.random.split(key, 5)

    # small shapes consistent with the module: innermost block, input_nc = outer_nc
    N, outer_nc, inner_nc, H, W = 2, 4, 8, 16, 16
    input_nc = outer_nc

    x = jax.random.normal(k1, (N, input_nc, H, W), jnp.float32)
    # Conv2d weight:          (inner_nc, input_nc, 4, 4)   (OIHW)
    # ConvTranspose2d weight: (inner_nc, outer_nc, 4, 4)   (in, out, kH, kW)
    w_down = 0.1 * jax.random.normal(k2, (inner_nc, input_nc, 4, 4), jnp.float32)
    w_up = 0.1 * jax.random.normal(k3, (inner_nc, outer_nc, 4, 4), jnp.float32)
    gamma = 1.0 + 0.1 * jax.random.normal(k4, (outer_nc,), jnp.float32)
    beta = 0.1 * jax.random.normal(k5, (outer_nc,), jnp.float32)

    out = jax.jit(unet_innermost_forward)(x, w_down, w_up, gamma, beta)
    out = jax.block_until_ready(out)

    ref = reference_forward(x, w_down, w_up, gamma, beta)
    assert out.shape == (N, input_nc + outer_nc, H, W), out.shape
    assert jnp.allclose(out, ref, atol=1e-2, rtol=1e-2), \
        float(jnp.max(jnp.abs(out - ref)))
    print("KERNEL_OK")
</pallas_src>

<mosaic_0001>
module attributes {stable_mosaic.version = 11 : i64} {
  func.func @_act_matmul_kernel(%arg0: i32, %arg1: i32, %arg2: i32, %arg3: memref<1x128x128xbf16, #tpu.memory_space<vmem>>, %arg4: memref<1x128x128xbf16, #tpu.memory_space<vmem>>, %arg5: memref<1x128x128xbf16, #tpu.memory_space<vmem>>, %arg6: memref<128x128xf32, #tpu.memory_space<vmem>>) attributes {dimension_semantics = [#tpu.dimension_semantics<parallel>, #tpu.dimension_semantics<parallel>, #tpu.dimension_semantics<arbitrary>], iteration_bounds = array<i64: 1, 1, 1>, scalar_prefetch = 0 : i64, scratch_operands = 1 : i64, tpu.core_type = #tpu.core_type<tc>, window_params = [{transform_indices = @transform_0, window_bounds = array<i64: 1, 128, 128>}, {transform_indices = @transform_1, window_bounds = array<i64: 1, 128, 128>}, {transform_indices = @transform_2, window_bounds = array<i64: 1, 128, 128>}]} {
    %c0_i32 = arith.constant 0 : i32
    %0 = arith.cmpi eq, %arg2, %c0_i32 : i32
    %1 = arith.extui %0 : i1 to i32
    %c0_i32_0 = arith.constant 0 : i32
    %2 = arith.cmpi ne, %1, %c0_i32_0 : i32
    scf.if %2 {
      %cst_14 = arith.constant 0.000000e+00 : f32
      %19 = vector.broadcast %cst_14 : f32 to vector<128x128xf32>
      %c0_15 = arith.constant 0 : index
      %c0_16 = arith.constant 0 : index
      %20 = vector.load %arg6[%c0_15, %c0_16] : memref<128x128xf32, #tpu.memory_space<vmem>>, vector<128x128xf32>
      tpu.vector_store %arg6[%c0_15, %c0_16], %19 {strides = array<i32>} : memref<128x128xf32, #tpu.memory_space<vmem>>, vector<128x128xf32>,
    } else {
    }
    %c0 = arith.constant 0 : index
    %c0_1 = arith.constant 0 : index
    %c0_2 = arith.constant 0 : index
    %3 = vector.load %arg3[%c0, %c0_1, %c0_2] : memref<1x128x128xbf16, #tpu.memory_space<vmem>>, vector<1x128x128xbf16>
    %4 = vector.shape_cast %3 : vector<1x128x128xbf16> to vector<128x128xbf16>
    %cst = arith.constant 0.000000e+00 : bf16
    %5 = vector.broadcast %cst : bf16 to vector<128x128xbf16>
    %6 = arith.cmpf ogt, %4, %5 : vector<128x128xbf16>
    %cst_3 = arith.constant 2.001950e-01 : bf16
    %7 = vector.broadcast %cst_3 : bf16 to vector<128x128xbf16>
    %8 = arith.mulf %7, %4 : vector<128x128xbf16>
    %9 = arith.select %6, %4, %8 : vector<128x128xi1>, vector<128x128xbf16>
    %c0_4 = arith.constant 0 : index
    %c0_5 = arith.constant 0 : index
    %10 = vector.load %arg6[%c0_4, %c0_5] : memref<128x128xf32, #tpu.memory_space<vmem>>, vector<128x128xf32>
    %c0_6 = arith.constant 0 : index
    %c0_7 = arith.constant 0 : index
    %c0_8 = arith.constant 0 : index
    %11 = vector.load %arg4[%c0_6, %c0_7, %c0_8] : memref<1x128x128xbf16, #tpu.memory_space<vmem>>, vector<1x128x128xbf16>
    %12 = vector.shape_cast %11 : vector<1x128x128xbf16> to vector<128x128xbf16>
    %cst_9 = arith.constant dense<0.000000e+00> : vector<128x128xf32>
    %13 = tpu.matmul %9, %12, %cst_9 {dimension_numbers = #tpu.dot_dimension_numbers<[1], [0], [0], [1], [0, 0, 1, 1], [], []>} : vector<128x128xbf16>, vector<128x128xbf16>, vector<128x128xf32> -> vector<128x128xf32>
    %14 = arith.addf %10, %13 : vector<128x128xf32>
    %c0_10 = arith.constant 0 : index
    %c0_11 = arith.constant 0 : index
    %15 = vector.load %arg6[%c0_10, %c0_11] : memref<128x128xf32, #tpu.memory_space<vmem>>, vector<128x128xf32>
    tpu.vector_store %arg6[%c0_10, %c0_11], %14 {strides = array<i32>} : memref<128x128xf32, #tpu.memory_space<vmem>>, vector<128x128xf32>,
    %c0_i32_12 = arith.constant 0 : i32
    %16 = arith.cmpi eq, %arg2, %c0_i32_12 : i32
    %17 = arith.extui %16 : i1 to i32
    %c0_i32_13 = arith.constant 0 : i32
    %18 = arith.cmpi ne, %17, %c0_i32_13 : i32
    scf.if %18 {
      %c0_14 = arith.constant 0 : index
      %c0_15 = arith.constant 0 : index
      %19 = vector.load %arg6[%c0_14, %c0_15] : memref<128x128xf32, #tpu.memory_space<vmem>>, vector<128x128xf32>
      %20 = arith.truncf %19 : vector<128x128xf32> to vector<128x128xbf16>
      %c0_16 = arith.constant 0 : index
      %c0_17 = arith.constant 0 : index
      %c0_18 = arith.constant 0 : index
      %21 = vector.load %arg5[%c0_16, %c0_17, %c0_18] : memref<1x128x128xbf16, #tpu.memory_space<vmem>>, vector<1x128x128xbf16>
      %22 = vector.shape_cast %21 : vector<1x128x128xbf16> to vector<128x128xbf16>
      %23 = vector.shape_cast %20 : vector<128x128xbf16> to vector<1x128x128xbf16>
      tpu.vector_store %arg5[%c0_16, %c0_17, %c0_18], %23 {strides = array<i32>} : memref<1x128x128xbf16, #tpu.memory_space<vmem>>, vector<1x128x128xbf16>,
    } else {
    }
    return
  }
  func.func @transform_0(%arg0: i32, %arg1: i32, %arg2: i32) -> (i32, i32, i32) {
    %c0_i32 = arith.constant 0 : i32
    return %arg0, %arg1, %arg2 : i32, i32, i32
  }
  func.func @transform_1(%arg0: i32, %arg1: i32, %arg2: i32) -> (i32, i32, i32) {
    %c0_i32 = arith.constant 0 : i32
    %c0_i32_0 = arith.constant 0 : i32
    return %arg0, %arg2, %c0_i32 : i32, i32, i32
  }
  func.func @transform_2(%arg0: i32, %arg1: i32, %arg2: i32) -> (i32, i32, i32) {
    %c0_i32 = arith.constant 0 : i32
    %c0_i32_0 = arith.constant 0 : i32
    return %arg0, %arg1, %c0_i32 : i32, i32, i32
  }
}

module attributes {stable_mosaic.version = 11 : i64} {
  func.func @_act_matmul_kernel(%arg0: i32, %arg1: i32, %arg2: i32, %arg3: memref<1x128x128xbf16, #tpu.memory_space<vmem>>, %arg4: memref<1x128x128xbf16, #tpu.memory_space<vmem>>, %arg5: memref<1x128x128xf32, #tpu.memory_space<vmem>>, %arg6: memref<1x1x1x128xf32, #tpu.memory_space<vmem>>, %arg7: memref<1x1x1x128xf32, #tpu.memory_space<vmem>>, %arg8: memref<128x128xf32, #tpu.memory_space<vmem>>) attributes {dimension_semantics = [#tpu.dimension_semantics<parallel>, #tpu.dimension_semantics<parallel>, #tpu.dimension_semantics<arbitrary>], iteration_bounds = array<i64: 4, 1, 1>, scalar_prefetch = 0 : i64, scratch_operands = 1 : i64, tpu.core_type = #tpu.core_type<tc>, window_params = [{transform_indices = @transform_0, window_bounds = array<i64: 1, 128, 128>}, {transform_indices = @transform_1, window_bounds = array<i64: 1, 128, 128>}, {transform_indices = @transform_2, window_bounds = array<i64: 1, 128, 128>}, {transform_indices = @transform_3, window_bounds = array<i64: 1, 1, 1, 128>}, {transform_indices = @transform_4, window_bounds = array<i64: 1, 1, 1, 128>}]} {
    %c0_i32 = arith.constant 0 : i32
    %0 = arith.cmpi eq, %arg2, %c0_i32 : i32
    %1 = arith.extui %0 : i1 to i32
    %c0_i32_0 = arith.constant 0 : i32
    %2 = arith.cmpi ne, %1, %c0_i32_0 : i32
    scf.if %2 {
      %cst_13 = arith.constant 0.000000e+00 : f32
      %16 = vector.broadcast %cst_13 : f32 to vector<128x128xf32>
      %c0_14 = arith.constant 0 : index
      %c0_15 = arith.constant 0 : index
      %17 = vector.load %arg8[%c0_14, %c0_15] : memref<128x128xf32, #tpu.memory_space<vmem>>, vector<128x128xf32>
      tpu.vector_store %arg8[%c0_14, %c0_15], %16 {strides = array<i32>} : memref<128x128xf32, #tpu.memory_space<vmem>>, vector<128x128xf32>,
    } else {
    }
    %c0 = arith.constant 0 : index
    %c0_1 = arith.constant 0 : index
    %c0_2 = arith.constant 0 : index
    %3 = vector.load %arg3[%c0, %c0_1, %c0_2] : memref<1x128x128xbf16, #tpu.memory_space<vmem>>, vector<1x128x128xbf16>
    %4 = vector.shape_cast %3 : vector<1x128x128xbf16> to vector<128x128xbf16>
    %cst = arith.constant 0.000000e+00 : bf16
    %5 = vector.broadcast %cst : bf16 to vector<128x128xbf16>
    %6 = arith.maximumf %4, %5 : vector<128x128xbf16>
    %c0_3 = arith.constant 0 : index
    %c0_4 = arith.constant 0 : index
    %7 = vector.load %arg8[%c0_3, %c0_4] : memref<128x128xf32, #tpu.memory_space<vmem>>, vector<128x128xf32>
    %c0_5 = arith.constant 0 : index
    %c0_6 = arith.constant 0 : index
    %c0_7 = arith.constant 0 : index
    %8 = vector.load %arg4[%c0_5, %c0_6, %c0_7] : memref<1x128x128xbf16, #tpu.memory_space<vmem>>, vector<1x128x128xbf16>
    %9 = vector.shape_cast %8 : vector<1x128x128xbf16> to vector<128x128xbf16>
    %cst_8 = arith.constant dense<0.000000e+00> : vector<128x128xf32>
    %10 = tpu.matmul %6, %9, %cst_8 {dimension_numbers = #tpu.dot_dimension_numbers<[1], [0], [0], [1], [0, 0, 1, 1], [], []>} : vector<128x128xbf16>, vector<128x128xbf16>, vector<128x128xf32> -> vector<128x128xf32>
    %11 = arith.addf %7, %10 : vector<128x128xf32>
    %c0_9 = arith.constant 0 : index
    %c0_10 = arith.constant 0 : index
    %12 = vector.load %arg8[%c0_9, %c0_10] : memref<128x128xf32, #tpu.memory_space<vmem>>, vector<128x128xf32>
    tpu.vector_store %arg8[%c0_9, %c0_10], %11 {strides = array<i32>} : memref<128x128xf32, #tpu.memory_space<vmem>>, vector<128x128xf32>,
    %c0_i32_11 = arith.constant 0 : i32
    %13 = arith.cmpi eq, %arg2, %c0_i32_11 : i32
    %14 = arith.extui %13 : i1 to i32
    %c0_i32_12 = arith.constant 0 : i32
    %15 = arith.cmpi ne, %14, %c0_i32_12 : i32
    scf.if %15 {
      %c0_13 = arith.constant 0 : index
      %c0_14 = arith.constant 0 : index
      %16 = vector.load %arg8[%c0_13, %c0_14] : memref<128x128xf32, #tpu.memory_space<vmem>>, vector<128x128xf32>
      %c0_15 = arith.constant 0 : index
      %c0_16 = arith.constant 0 : index
      %c0_17 = arith.constant 0 : index
      %17 = vector.load %arg5[%c0_15, %c0_16, %c0_17] : memref<1x128x128xf32, #tpu.memory_space<vmem>>, vector<1x128x128xf32>
      %18 = vector.shape_cast %17 : vector<1x128x128xf32> to vector<128x128xf32>
      %19 = vector.shape_cast %16 : vector<128x128xf32> to vector<1x128x128xf32>
      tpu.vector_store %arg5[%c0_15, %c0_16, %c0_17], %19 {strides = array<i32>} : memref<1x128x128xf32, #tpu.memory_space<vmem>>, vector<1x128x128xf32>,
      %cst_18 = arith.constant dense<0.000000e+00> : vector<128xf32>
      %20 = vector.multi_reduction <add>, %16, %cst_18 [0] : vector<128x128xf32> to vector<128xf32>
      %21 = vector.shape_cast %20 : vector<128xf32> to vector<1x128xf32>
      %c0_19 = arith.constant 0 : index
      %c0_20 = arith.constant 0 : index
      %c0_21 = arith.constant 0 : index
      %c0_22 = arith.constant 0 : index
      %22 = vector.load %arg6[%c0_19, %c0_20, %c0_21, %c0_22] : memref<1x1x1x128xf32, #tpu.memory_space<vmem>>, vector<1x1x1x128xf32>
      %23 = vector.shape_cast %22 : vector<1x1x1x128xf32> to vector<1x128xf32>
      %24 = vector.shape_cast %21 : vector<1x128xf32> to vector<1x1x1x128xf32>
      tpu.vector_store %arg6[%c0_19, %c0_20, %c0_21, %c0_22], %24 {strides = array<i32>} : memref<1x1x1x128xf32, #tpu.memory_space<vmem>>, vector<1x1x1x128xf32>,
      %25 = arith.mulf %16, %16 : vector<128x128xf32>
      %cst_23 = arith.constant dense<0.000000e+00> : vector<128xf32>
      %26 = vector.multi_reduction <add>, %25, %cst_23 [0] : vector<128x128xf32> to vector<128xf32>
      %27 = vector.shape_cast %26 : vector<128xf32> to vector<1x128xf32>
      %c0_24 = arith.constant 0 : index
      %c0_25 = arith.constant 0 : index
      %c0_26 = arith.constant 0 : index
      %c0_27 = arith.constant 0 : index
      %28 = vector.load %arg7[%c0_24, %c0_25, %c0_26, %c0_27] : memref<1x1x1x128xf32, #tpu.memory_space<vmem>>, vector<1x1x1x128xf32>
      %29 = vector.shape_cast %28 : vector<1x1x1x128xf32> to vector<1x128xf32>
      %30 = vector.shape_cast %27 : vector<1x128xf32> to vector<1x1x1x128xf32>
      tpu.vector_store %arg7[%c0_24, %c0_25, %c0_26, %c0_27], %30 {strides = array<i32>} : memref<1x1x1x128xf32, #tpu.memory_space<vmem>>, vector<1x1x1x128xf32>,
    } else {
    }
    return
  }
  func.func @transform_0(%arg0: i32, %arg1: i32, %arg2: i32) -> (i32, i32, i32) {
    %c0_i32 = arith.constant 0 : i32
    return %arg0, %arg1, %arg2 : i32, i32, i32
  }
  func.func @transform_1(%arg0: i32, %arg1: i32, %arg2: i32) -> (i32, i32, i32) {
    %c0_i32 = arith.constant 0 : i32
    %c0_i32_0 = arith.constant 0 : i32
    return %arg0, %arg2, %c0_i32 : i32, i32, i32
  }
  func.func @transform_2(%arg0: i32, %arg1: i32, %arg2: i32) -> (i32, i32, i32) {
    %c0_i32 = arith.constant 0 : i32
    %c0_i32_0 = arith.constant 0 : i32
    return %arg0, %arg1, %c0_i32 : i32, i32, i32
  }
  func.func @transform_3(%arg0: i32, %arg1: i32, %arg2: i32) -> (i32, i32, i32, i32) {
    %c0_i32 = arith.constant 0 : i32
    %c0_i32_0 = arith.constant 0 : i32
    %c0_i32_1 = arith.constant 0 : i32
    return %arg0, %arg1, %c0_i32, %c0_i32_0 : i32, i32, i32, i32
  }
  func.func @transform_4(%arg0: i32, %arg1: i32, %arg2: i32) -> (i32, i32, i32, i32) {
    %c0_i32 = arith.constant 0 : i32
    %c0_i32_0 = arith.constant 0 : i32
    %c0_i32_1 = arith.constant 0 : i32
    return %arg0, %arg1, %c0_i32, %c0_i32_0 : i32, i32, i32, i32
  }
}

module attributes {stable_mosaic.version = 11 : i64} {
  func.func @_bn_apply_kernel(%arg0: i32, %arg1: i32, %arg2: memref<1x128x128xf32, #tpu.memory_space<vmem>>, %arg3: memref<1x128xf32, #tpu.memory_space<vmem>>, %arg4: memref<1x128xf32, #tpu.memory_space<vmem>>, %arg5: memref<1x128xf32, #tpu.memory_space<vmem>>, %arg6: memref<1x128xf32, #tpu.memory_space<vmem>>, %arg7: memref<1x128x128xf32, #tpu.memory_space<vmem>>) attributes {dimension_semantics = [#tpu.dimension_semantics<parallel>, #tpu.dimension_semantics<parallel>], iteration_bounds = array<i64: 4, 1>, scalar_prefetch = 0 : i64, scratch_operands = 0 : i64, tpu.core_type = #tpu.core_type<tc>, window_params = [{transform_indices = @transform_0, window_bounds = array<i64: 1, 128, 128>}, {pipeline_mode = #tpu.pipeline_mode<synchronous>, transform_indices = @transform_1, window_bounds = array<i64: 1, 128>}, {pipeline_mode = #tpu.pipeline_mode<synchronous>, transform_indices = @transform_2, window_bounds = array<i64: 1, 128>}, {pipeline_mode = #tpu.pipeline_mode<synchronous>, transform_indices = @transform_3, window_bounds = array<i64: 1, 128>}, {pipeline_mode = #tpu.pipeline_mode<synchronous>, transform_indices = @transform_4, window_bounds = array<i64: 1, 128>}, {transform_indices = @transform_5, window_bounds = array<i64: 1, 128, 128>}]} {
    %c0 = arith.constant 0 : index
    %c0_0 = arith.constant 0 : index
    %0 = vector.load %arg5[%c0, %c0_0] : memref<1x128xf32, #tpu.memory_space<vmem>>, vector<1x128xf32>
    %c0_1 = arith.constant 0 : index
    %c0_2 = arith.constant 0 : index
    %1 = vector.load %arg4[%c0_1, %c0_2] : memref<1x128xf32, #tpu.memory_space<vmem>>, vector<1x128xf32>
    %cst = arith.constant 9.99999974E-6 : f32
    %2 = vector.broadcast %cst : f32 to vector<1x128xf32>
    %3 = arith.addf %1, %2 : vector<1x128xf32>
    %4 = math.rsqrt %3 : vector<1x128xf32>
    %5 = arith.mulf %0, %4 : vector<1x128xf32>
    %c0_3 = arith.constant 0 : index
    %c0_4 = arith.constant 0 : index
    %6 = vector.load %arg6[%c0_3, %c0_4] : memref<1x128xf32, #tpu.memory_space<vmem>>, vector<1x128xf32>
    %c0_5 = arith.constant 0 : index
    %c0_6 = arith.constant 0 : index
    %7 = vector.load %arg3[%c0_5, %c0_6] : memref<1x128xf32, #tpu.memory_space<vmem>>, vector<1x128xf32>
    %8 = arith.mulf %7, %5 : vector<1x128xf32>
    %9 = arith.subf %6, %8 : vector<1x128xf32>
    %c0_7 = arith.constant 0 : index
    %c0_8 = arith.constant 0 : index
    %c0_9 = arith.constant 0 : index
    %10 = vector.load %arg2[%c0_7, %c0_8, %c0_9] : memref<1x128x128xf32, #tpu.memory_space<vmem>>, vector<1x128x128xf32>
    %11 = vector.shape_cast %10 : vector<1x128x128xf32> to vector<128x128xf32>
    %12 = vector.broadcast %5 : vector<1x128xf32> to vector<128x128xf32>
    %13 = arith.mulf %11, %12 : vector<128x128xf32>
    %14 = vector.broadcast %9 : vector<1x128xf32> to vector<128x128xf32>
    %15 = arith.addf %13, %14 : vector<128x128xf32>
    %c0_10 = arith.constant 0 : index
    %c0_11 = arith.constant 0 : index
    %c0_12 = arith.constant 0 : index
    %16 = vector.load %arg7[%c0_10, %c0_11, %c0_12] : memref<1x128x128xf32, #tpu.memory_space<vmem>>, vector<1x128x128xf32>
    %17 = vector.shape_cast %16 : vector<1x128x128xf32> to vector<128x128xf32>
    %18 = vector.shape_cast %15 : vector<128x128xf32> to vector<1x128x128xf32>
    tpu.vector_store %arg7[%c0_10, %c0_11, %c0_12], %18 {strides = array<i32>} : memref<1x128x128xf32, #tpu.memory_space<vmem>>, vector<1x128x128xf32>,
    return
  }
  func.func @transform_0(%arg0: i32, %arg1: i32) -> (i32, i32, i32) {
    %c0_i32 = arith.constant 0 : i32
    %c0_i32_0 = arith.constant 0 : i32
    return %arg0, %arg1, %c0_i32 : i32, i32, i32
  }
  func.func @transform_1(%arg0: i32, %arg1: i32) -> (i32, i32) {
    %c0_i32 = arith.constant 0 : i32
    %c0_i32_0 = arith.constant 0 : i32
    %c0_i32_1 = arith.constant 0 : i32
    return %c0_i32, %c0_i32_0 : i32, i32
  }
  func.func @transform_2(%arg0: i32, %arg1: i32) -> (i32, i32) {
    %c0_i32 = arith.constant 0 : i32
    %c0_i32_0 = arith.constant 0 : i32
    %c0_i32_1 = arith.constant 0 : i32
    return %c0_i32, %c0_i32_0 : i32, i32
  }
  func.func @transform_3(%arg0: i32, %arg1: i32) -> (i32, i32) {
    %c0_i32 = arith.constant 0 : i32
    %c0_i32_0 = arith.constant 0 : i32
    %c0_i32_1 = arith.constant 0 : i32
    return %c0_i32, %c0_i32_0 : i32, i32
  }
  func.func @transform_4(%arg0: i32, %arg1: i32) -> (i32, i32) {
    %c0_i32 = arith.constant 0 : i32
    %c0_i32_0 = arith.constant 0 : i32
    %c0_i32_1 = arith.constant 0 : i32
    return %c0_i32, %c0_i32_0 : i32, i32
  }
  func.func @transform_5(%arg0: i32, %arg1: i32) -> (i32, i32, i32) {
    %c0_i32 = arith.constant 0 : i32
    %c0_i32_0 = arith.constant 0 : i32
    return %arg0, %arg1, %c0_i32 : i32, i32, i32
  }
}

</mosaic_0001>

<bundles_post_ra>
// kernel: unet_innermost_forward.3
= control target key start
LH: loop header
LB: loop body
LE: loop exit
PB: predicated region body
PF: predicated region fallthrough
CT: control target
= control target key end

     0   :  { %s739_s1 = inlined_call_operand.vmem [shape: bf16[1,128,128], index: 1, kind: input, shape index: {}]   ;;  %s740_s0 = inlined_call_operand.vmem [shape: bf16[1,128,128], index: 0, kind: input, shape index: {}]   ;;  %s741_s2 = inlined_call_operand.vmem [shape: bf16[1,128,128], index: 2, kind: output, shape index: {}]  }
   0x1   :  { %v616_v0 = vld [vmem:[%s739_s1] sm:$0xff]   ;;  %v617_v1 = vld [vmem:[%s739_s1 + $0x8] sm:$0xff]   ;;  %v618_v2 = vld [vmem:[%s739_s1 + $0x10] sm:$0xff]  }
   0x2   :  { %568 = vmatprep.subr.bf16.mxu0 %v616_v0  ;;  %600 = vmatprep.subr.bf16.mxu1 %v616_v0  ;;  %v619_v3 = vld [vmem:[%s739_s1 + $0x18] sm:$0xff]   ;;  %v33_v4 = vld [vmem:[%s740_s0] sm:$0xf]  ;;  %v34_v5 = vld [vmem:[%s740_s0 + $0x4] sm:$0xf] }
   0x3   :  { %569 = vmatpush3.bf16.msra.mxu0 %v616_v0  ;;  %608 = vmatpush3.bf16.msra.mxu1 %v616_v0  ;;  %v41_v6 = vld [vmem:[%s740_s0 + $0x20] sm:$0xf]  ;;  %vm49_vm0 = vcmp.gt.bf16.partialorder %v33_v4, 0  ;;  %vm50_vm1 = vcmp.gt.bf16.partialorder %v34_v5, 0  ;;  %v65_v7 = vmul.bf16 1045249613, %v33_v4 }
   0x4   :  { %570 = vmatprep.subr.bf16.mxu0 %v617_v1  ;;  %601 = vmatprep.subr.bf16.mxu1 %v617_v1  ;;  %v66_v8 = vmul.bf16 1045249613, %v34_v5  ;;  %v42_v9 = vld [vmem:[%s740_s0 + $0x24] sm:$0xf]  ;;  %vm57_vm2 = vcmp.gt.bf16.partialorder %v41_v6, 0  ;;  %v621_v19 = vld [vmem:[%s739_s1 + $0x28] sm:$0xff]  }
   0x5   :  { %v73_v10 = vmul.bf16 1045249613, %v41_v6  ;;  %v81_v11 = vsel %vm49_vm0, %v33_v4, %v65_v7  ;;  %vm58_vm3 = vcmp.gt.bf16.partialorder %v42_v9, 0  ;;  %v74_v13 = vmul.bf16 1045249613, %v42_v9  ;;  %v620_v14 = vld [vmem:[%s739_s1 + $0x20] sm:$0xff]  }
   0x6   :  { %v82_v12 = vsel %vm50_vm1, %v34_v5, %v66_v8  ;;  %v35_v20 = vld [vmem:[%s740_s0 + $0x8] sm:$0xf]  ;;  %v36_v21 = vld [vmem:[%s740_s0 + $0xc] sm:$0xf]  ;;  %v622_v22 = vld [vmem:[%s739_s1 + $0x30] sm:$0xff]  }
   0x7   :  { %571 = vmatpush3.bf16.msra.mxu0 %v617_v1  ;;  %609 = vmatpush3.bf16.msra.mxu1 %v617_v1  ;;  %v457_v15 = vcombine.low %v81_v11, %v82_v12  ;;  %v89_v16 = vsel %vm57_vm2, %v41_v6, %v73_v10  ;;  %v90_v17 = vsel %vm58_vm3, %v42_v9, %v74_v13  ;;  %v43_v23 = vld [vmem:[%s740_s0 + $0x28] sm:$0xf]  ;;  %v44_v24 = vld [vmem:[%s740_s0 + $0x2c] sm:$0xf]  ;;  %v67_v25 = vmul.bf16 1045249613, %v35_v20 }
   0x8   :  { %572 = vmatprep.subr.bf16.mxu0 %v618_v2  ;;  %602 = vmatprep.subr.bf16.mxu1 %v618_v2  ;;  %v461_v18 = vcombine.low %v89_v16, %v90_v17  ;;  %v37_v26 = vld [vmem:[%s740_s0 + $0x10] sm:$0xf]  ;;  %v38_v27 = vld [vmem:[%s740_s0 + $0x14] sm:$0xf]  ;;  %vm51_vm4 = vcmp.gt.bf16.partialorder %v35_v20, 0  ;;  %vm52_vm5 = vcmp.gt.bf16.partialorder %v36_v21, 0 }
   0x9   :  { %584 = vmatprep.mubr.bf16.mxu0 %v457_v15  ;;  %v45_v28 = vld [vmem:[%s740_s0 + $0x30] sm:$0xf]  ;;  %v46_v29 = vld [vmem:[%s740_s0 + $0x34] sm:$0xf]  ;;  %v623_v30 = vld [vmem:[%s739_s1 + $0x38] sm:$0xff]   ;;  %vm59_vm6 = vcmp.gt.bf16.partialorder %v43_v23, 0  ;;  %v83_v38 = vsel %vm51_vm4, %v35_v20, %v67_v25 }
   0xa   :  { %592 = vmatprep.mubr.bf16.mxu1 %v461_v18  ;;  %v68_v31 = vmul.bf16 1045249613, %v36_v21  ;;  %vm60_vm7 = vcmp.gt.bf16.partialorder %v44_v24, 0  ;;  %v75_v32 = vmul.bf16 1045249613, %v43_v23  ;;  %vm53_vm8 = vcmp.gt.bf16.partialorder %v37_v26, 0 }
   0xb   :  { %573 = vmatpush3.bf16.msra.mxu0 %v618_v2  ;;  %610 = vmatpush3.bf16.msra.mxu1 %v618_v2  ;;  %v76_v33 = vmul.bf16 1045249613, %v44_v24  ;;  %v69_v34 = vmul.bf16 1045249613, %v37_v26  ;;  %v70_v35 = vmul.bf16 1045249613, %v38_v27 }
   0xc   :  { %574 = vmatprep.subr.bf16.mxu0 %v619_v3  ;;  %603 = vmatprep.subr.bf16.mxu1 %v619_v3  ;;  %vm54_vm9 = vcmp.gt.bf16.partialorder %v38_v27, 0  ;;  %v77_v36 = vmul.bf16 1045249613, %v45_v28  ;;  %v78_v37 = vmul.bf16 1045249613, %v46_v29  ;;  %vm61_vm10 = vcmp.gt.bf16.partialorder %v45_v28, 0 }
   0xd   :  { %vm62_vm11 = vcmp.gt.bf16.partialorder %v46_v29, 0  ;;  %v84_v39 = vsel %vm52_vm5, %v36_v21, %v68_v31  ;;  %v91_v40 = vsel %vm59_vm6, %v43_v23, %v75_v32  ;;  %v92_v41 = vsel %vm60_vm7, %v44_v24, %v76_v33  ;;  %v39_v44 = vld [vmem:[%s740_s0 + $0x18] sm:$0xf]  ;;  %v40_v47 = vld [vmem:[%s740_s0 + $0x1c] sm:$0xf] }
   0xe   :  { %v85_v42 = vsel %vm53_vm8, %v37_v26, %v69_v34  ;;  %v86_v43 = vsel %vm54_vm9, %v38_v27, %v70_v35  ;;  %v93_v45 = vsel %vm61_vm10, %v45_v28, %v77_v36  ;;  %v94_v46 = vsel %vm62_vm11, %v46_v29, %v78_v37  ;;  %v47_v48 = vld [vmem:[%s740_s0 + $0x38] sm:$0xf]  ;;  %v48_v49 = vld [vmem:[%s740_s0 + $0x3c] sm:$0xf] }
   0xf   :  { %575 = vmatpush3.bf16.msra.mxu0 %v619_v3  ;;  %611 = vmatpush3.bf16.msra.mxu1 %v619_v3  ;;  %v458_v50 = vcombine.low %v83_v38, %v84_v39  ;;  %v462_v51 = vcombine.low %v91_v40, %v92_v41  ;;  %v459_v52 = vcombine.low %v85_v42, %v86_v43  ;;  %vm55_vm12 = vcmp.gt.bf16.partialorder %v39_v44, 0 }
  0x10   :  { %576 = vmatprep.subr.bf16.mxu0 %v620_v14  ;;  %604 = vmatprep.subr.bf16.mxu1 %v620_v14  ;;  %v71_v53 = vmul.bf16 1045249613, %v39_v44  ;;  %v463_v54 = vcombine.low %v93_v45, %v94_v46  ;;  %v72_v55 = vmul.bf16 1045249613, %v40_v47  ;;  %v79_v56 = vmul.bf16 1045249613, %v47_v48 }
  0x11   :  { %v80_v57 = vmul.bf16 1045249613, %v48_v49  ;;  %vm56_vm13 = vcmp.gt.bf16.partialorder %v40_v47, 0  ;;  %vm63_vm14 = vcmp.gt.bf16.partialorder %v47_v48, 0  ;;  %vm64_vm15 = vcmp.gt.bf16.partialorder %v48_v49, 0 }
  0x12   :  { %v87_v58 = vsel %vm55_vm12, %v39_v44, %v71_v53  ;;  %v88_v59 = vsel %vm56_vm13, %v40_v47, %v72_v55  ;;  %v95_v60 = vsel %vm63_vm14, %v47_v48, %v79_v56 }
  0x13   :  { %577 = vmatpush3.bf16.msra.mxu0 %v620_v14  ;;  %612 = vmatpush3.bf16.msra.mxu1 %v620_v14  ;;  %v96_v61 = vsel %vm64_vm15, %v48_v49, %v80_v57  ;;  %v460_v62 = vcombine.low %v87_v58, %v88_v59 }
  0x14   :  { %578 = vmatprep.subr.bf16.mxu0 %v621_v19  ;;  %605 = vmatprep.subr.bf16.mxu1 %v621_v19  ;;  %v464_v63 = vcombine.low %v95_v60, %v96_v61 }
  0x17   :  { %579 = vmatpush3.bf16.msra.mxu0 %v621_v19  ;;  %613 = vmatpush3.bf16.msra.mxu1 %v621_v19 }
  0x18   :  { %580 = vmatprep.subr.bf16.mxu0 %v622_v22  ;;  %606 = vmatprep.subr.bf16.mxu1 %v622_v22 }
  0x1b   :  { %581 = vmatpush3.bf16.msra.mxu0 %v622_v22  ;;  %614 = vmatpush3.bf16.msra.mxu1 %v622_v22 }
  0x1c   :  { %582 = vmatprep.subr.bf16.mxu0 %v623_v30  ;;  %607 = vmatprep.subr.bf16.mxu1 %v623_v30 }
  0x1f   :  { %583 = vmatpush3.bf16.msra.mxu0 %v623_v30  ;;  %615 = vmatpush3.bf16.msra.mxu1 %v623_v30 }
  0x22   :  { %585 = vmatmul.mubr.bf16.vlgmr.msra.gmra.mrb[0].mxu0 %v458_v50  ;;  %593 = vmatmul.mubr.bf16.vlgmr.msra.gmra.mrb[0].mxu1 %v462_v51 }
  0x23   :  { %588 = vmatprep.mubr.bf16.mxu0 %v459_v52  ;;  %596 = vmatprep.mubr.bf16.mxu1 %v463_v54 }
  0x2a   :  { %589 = vmatmul.mubr.bf16.gmra.mrb[4].mxu0 %v460_v62  ;;  %597 = vmatmul.mubr.bf16.gmra.mrb[4].mxu1 %v464_v63 }
  0xf5   :  { %v586_v0 = vpop.f32.mrb[0].mxu0  ;;  %v594_v1 = vpop.f32.mrb[0].mxu1 }
  0xf6   :  { %v259_v2 = vpop.f32.mrb[1].mxu0  ;;  %v291_v3 = vpop.f32.mrb[1].mxu1 }
  0xf7   :  { %v587_v4 = vpop.f32.mrb[2].mxu0  ;;  %v595_v5 = vpop.f32.mrb[2].mxu1 }
  0xf8   :  { %v513_v6 = vpack.c.bf16 %v587_v4, %v586_v0  ;;  %v533_v7 = vpack.c.bf16 %v595_v5, %v594_v1  ;;  %v262_v8 = vpop.f32.mrb[3].mxu0  ;;  %v294_v9 = vpop.f32.mrb[3].mxu1 }
  0xf9   :  { %v508_v10 = vpack.c.bf16 %v262_v8, %v259_v2  ;;  %v528_v11 = vpack.c.bf16 %v294_v9, %v291_v3 }
  0xfa   :  { %545 = vst [vmem:[%s741_s2 + $0x8] sm:$0xff] %v513_v6   ;;  %549 = vst [vmem:[%s741_s2 + $0x28] sm:$0xff] %v533_v7  }
  0xfb   :  { %509 = vst [vmem:[%s741_s2] sm:$0xff] %v508_v10   ;;  %548 = vst [vmem:[%s741_s2 + $0x20] sm:$0xff] %v528_v11  }
  0xfd   :  { %v590_v12 = vpop.f32.mrb[4].mxu0  ;;  %v598_v13 = vpop.f32.mrb[4].mxu1 }
  0xfe   :  { %v275_v14 = vpop.f32.mrb[5].mxu0  ;;  %v307_v15 = vpop.f32.mrb[5].mxu1 }
  0xff   :  { %v591_v16 = vpop.f32.mrb[6].mxu0  ;;  %v599_v17 = vpop.f32.mrb[6].mxu1 }
 0x100   :  { %v523_v18 = vpack.c.bf16 %v591_v16, %v590_v12  ;;  %v543_v19 = vpack.c.bf16 %v599_v17, %v598_v13  ;;  %v278_v20 = vpop.f32.mrb[7].mxu0  ;;  %v310_v21 = vpop.f32.mrb[7].mxu1 }
 0x101   :  { %v518_v22 = vpack.c.bf16 %v278_v20, %v275_v14  ;;  %v538_v23 = vpack.c.bf16 %v310_v21, %v307_v15 }
 0x102   :  { %547 = vst [vmem:[%s741_s2 + $0x18] sm:$0xff] %v523_v18   ;;  %551 = vst [vmem:[%s741_s2 + $0x38] sm:$0xff] %v543_v19  }
 0x103   :  { %546 = vst [vmem:[%s741_s2 + $0x10] sm:$0xff] %v518_v22   ;;  %550 = vst [vmem:[%s741_s2 + $0x30] sm:$0xff] %v538_v23  }

// kernel: unet_innermost_forward.5
= control target key start
LH: loop header
LB: loop body
LE: loop exit
PB: predicated region body
PF: predicated region fallthrough
CT: control target
= control target key end

     0   :  { %s529_s18 = smov 0   ;;  %s531_s19 = smov 0   ;;  %s617_s0 = inlined_call_operand.vmem [shape: f32[4,128,128], index: 0, kind: input, shape index: {}]   ;;  %s618_s1 = inlined_call_operand.vmem [shape: f32[1,128], index: 1, kind: input, shape index: {}]   ;;  %s619_s2 = inlined_call_operand.vmem [shape: f32[1,128], index: 2, kind: input, shape index: {}]   ;;  %s620_s3 = inlined_call_operand.vmem [shape: f32[1,128], index: 3, kind: input, shape index: {}]   ;;  %s621_s4 = inlined_call_operand.vmem [shape: f32[1,128], index: 4, kind: input, shape index: {}]   ;;  %s622_s5 = inlined_call_operand.vmem [shape: f32[4,128,128], index: 5, kind: output, shape index: {}]  }
   0x1   :  { %s533_s20 = smov 0  }
   0x2 LB: > { %s27_s21 = sadd.s32 1, %s493_s19  ;;  %p440_p0 = scmp.ge.s32.totalorder %s497_s20, 1  ;;  %s497_s20 = sphi %s533_s20, %s15_s20   ;;  %s493_s19 = sphi %s531_s19, %s624_s19   ;;  %s489_s18 = sphi %s529_s18, %s623_s18  }
   0x3   : > { %p29_p1 = scmp.ge.s32.totalorder %s27_s21, 4  ;;  %p208_p2 = scmp.lt.s32.totalorder %s497_s20, 5 }
   0x5   : > { %s626_s21 = smov (%p29_p1, %s27_s21), 0  ;;  %p209_p3 = pnand %p440_p0, %p208_p2 }
   0x6   : > { %p245_p4 = scmp.lt.s32.totalorder (!%p209_p3), %s489_s18, 3  ;;  %v265_v0 = vld [vmem:[%s619_s2] sm:$0x1] (!%p209_p3)  ;;  %v290_v2 = vlaneseq (!%p209_p3) }
   0x7   : > { %212 = sbr.rel (%p209_p3) target bundleno = 38 (0x26), region = 40  ;;  %v266_v1 = vadd.f32 (!%p209_p3), 1e-05, %v265_v0  ;;  %v264_v4 = vld [vmem:[%s620_s3] sm:$0x1] (!%p209_p3) }
   0x8   : > { %v291_v3 = vshrl.u32 (!%p209_p3), %v290_v2, 7  ;;  %v270_v7 = vld [vmem:[%s618_s1] sm:$0x1] (!%p209_p3) }
   0x9   : > { %473 = vrsqrt.f32 (!%p209_p3), %v266_v1  ;;  %v269_v9 = vld [vmem:[%s621_s4] sm:$0x1] (!%p209_p3) }
   0xa   : > { %v292_v5 = vsub.s32 (!%p209_p3), 0, %v291_v3 }
   0xe   : > { %s628_s18 = smov (!%p245_p4, %s489_s18), 3 }
   0xf   : > { %s447_s24 = sshll.u32 %s628_s18, 7 }
  0x10   : > { %s558_s27 = scalar_lea.vmem %s617_s0, %s447_s24  ;;  %s588_s11 = scalar_lea.vmem %s622_s5, %s447_s24 }
  0x11   : > { %v273_v10 = vld [vmem:[%s558_s27] sm:$0xff]  ;;  %v274_v11 = vld [vmem:[%s558_s27 + $0x8] sm:$0xff]  ;;  %v275_v12 = vld [vmem:[%s558_s27 + $0x10] sm:$0xff] }
  0x12   : > { %v276_v13 = vld [vmem:[%s558_s27 + $0x18] sm:$0xff]  ;;  %v277_v14 = vld [vmem:[%s558_s27 + $0x20] sm:$0xff]  ;;  %v278_v17 = vld [vmem:[%s558_s27 + $0x28] sm:$0xff] }
  0x13   : > { %v474_v6 = vpop.eup %473  ;;  %v279_v18 = vld [vmem:[%s558_s27 + $0x30] sm:$0xff]  ;;  %v280_v19 = vld [vmem:[%s558_s27 + $0x38] sm:$0xff]  ;;  %v281_v20 = vld [vmem:[%s558_s27 + $0x40] sm:$0xff] }
  0x14   : > { %v268_v8 = vmul.f32 %v474_v6, %v264_v4  ;;  %v282_v21 = vld [vmem:[%s558_s27 + $0x48] sm:$0xff]  ;;  %v283_v22 = vld [vmem:[%s558_s27 + $0x50] sm:$0xff]  ;;  %v284_v27 = vld [vmem:[%s558_s27 + $0x58] sm:$0xff] }
  0x15   : > { %v285_v28 = vld [vmem:[%s558_s27 + $0x60] sm:$0xff]  ;;  %v286_v29 = vld [vmem:[%s558_s27 + $0x68] sm:$0xff]  ;;  %v287_v46 = vld [vmem:[%s558_s27 + $0x70] sm:$0xff] }
  0x16   : > { %v271_v15 = vmul.f32 %v270_v7, %v268_v8  ;;  %v293_v16 = vrot.slane %v268_v8, %v292_v5  ;;  %v288_v47 = vld [vmem:[%s558_s27 + $0x78] sm:$0xff] }
  0x18   : > { %v272_v23 = vsub.f32 %v269_v9, %v271_v15  ;;  %v295_v24 = vmul.f32 %v293_v16, %v273_v10  ;;  %v296_v25 = vmul.f32 %v293_v16, %v274_v11  ;;  %v297_v26 = vmul.f32 %v293_v16, %v275_v12 }
  0x19   : > { %v298_v30 = vmul.f32 %v293_v16, %v276_v13  ;;  %v299_v31 = vmul.f32 %v293_v16, %v277_v14  ;;  %v300_v32 = vmul.f32 %v293_v16, %v278_v17  ;;  %v301_v33 = vmul.f32 %v293_v16, %v279_v18 }
  0x1a   : > { %v315_v34 = vrot.slane %v272_v23, %v292_v5  ;;  %v302_v35 = vmul.f32 %v293_v16, %v280_v19  ;;  %v303_v36 = vmul.f32 %v293_v16, %v281_v20  ;;  %v304_v37 = vmul.f32 %v293_v16, %v282_v21 }
  0x1b   : > { %v305_v38 = vmul.f32 %v293_v16, %v283_v22  ;;  %v306_v39 = vmul.f32 %v293_v16, %v284_v27  ;;  %v307_v40 = vmul.f32 %v293_v16, %v285_v28  ;;  %v308_v41 = vmul.f32 %v293_v16, %v286_v29 }
  0x1c   : > { %v317_v42 = vadd.f32 %v315_v34, %v295_v24  ;;  %v318_v43 = vadd.f32 %v315_v34, %v296_v25  ;;  %v319_v44 = vadd.f32 %v315_v34, %v297_v26  ;;  %v320_v45 = vadd.f32 %v315_v34, %v298_v30 }
  0x1d   : > { %v321_v48 = vadd.f32 %v315_v34, %v299_v31  ;;  %v322_v49 = vadd.f32 %v315_v34, %v300_v32  ;;  %v323_v50 = vadd.f32 %v315_v34, %v301_v33  ;;  %v324_v51 = vadd.f32 %v315_v34, %v302_v35 }
  0x1e   : > { %333 = vst [vmem:[%s588_s11] sm:$0xff] %v317_v42  ;;  %334 = vst [vmem:[%s588_s11 + $0x8] sm:$0xff] %v318_v43  ;;  %v325_v52 = vadd.f32 %v315_v34, %v303_v36  ;;  %v326_v53 = vadd.f32 %v315_v34, %v304_v37  ;;  %v327_v54 = vadd.f32 %v315_v34, %v305_v38 }
  0x1f   : > { %335 = vst [vmem:[%s588_s11 + $0x10] sm:$0xff] %v319_v44  ;;  %336 = vst [vmem:[%s588_s11 + $0x18] sm:$0xff] %v320_v45  ;;  %v328_v55 = vadd.f32 %v315_v34, %v306_v39  ;;  %v329_v56 = vadd.f32 %v315_v34, %v307_v40  ;;  %v330_v57 = vadd.f32 %v315_v34, %v308_v41 }
  0x20   : > { %337 = vst [vmem:[%s588_s11 + $0x20] sm:$0xff] %v321_v48  ;;  %338 = vst [vmem:[%s588_s11 + $0x28] sm:$0xff] %v322_v49  ;;  %v309_v58 = vmul.f32 %v293_v16, %v287_v46  ;;  %v310_v59 = vmul.f32 %v293_v16, %v288_v47 }
  0x21   : > { %339 = vst [vmem:[%s588_s11 + $0x30] sm:$0xff] %v323_v50  ;;  %340 = vst [vmem:[%s588_s11 + $0x38] sm:$0xff] %v324_v51 }
  0x22   : > { %341 = vst [vmem:[%s588_s11 + $0x40] sm:$0xff] %v325_v52  ;;  %342 = vst [vmem:[%s588_s11 + $0x48] sm:$0xff] %v326_v53  ;;  %v331_v60 = vadd.f32 %v315_v34, %v309_v58  ;;  %v332_v61 = vadd.f32 %v315_v34, %v310_v59 }
  0x23   : > { %343 = vst [vmem:[%s588_s11 + $0x50] sm:$0xff] %v327_v54  ;;  %344 = vst [vmem:[%s588_s11 + $0x58] sm:$0xff] %v328_v55 }
  0x24   : > { %345 = vst [vmem:[%s588_s11 + $0x60] sm:$0xff] %v329_v56  ;;  %346 = vst [vmem:[%s588_s11 + $0x68] sm:$0xff] %v330_v57 }
  0x25   : > { %347 = vst [vmem:[%s588_s11 + $0x70] sm:$0xff] %v331_v60  ;;  %348 = vst [vmem:[%s588_s11 + $0x78] sm:$0xff] %v332_v61 }
  0x26 PF: > { %s15_s20 = sadd.s32 1, %s497_s20   ;;  %s623_s18 = smov %s493_s19 }
  0x27   : > { %p12_p5 = scmp.ge.s32.totalorder %s15_s20, 6   ;;  %s624_s19 = smov %s626_s21 }
  0x29   :  { %14 = sbr.rel (!%p12_p5) target bundleno = 2 (0x2), region = 70 }

// kernel: unet_innermost_forward.4
= control target key start
LH: loop header
LB: loop body
LE: loop exit
PB: predicated region body
PF: predicated region fallthrough
CT: control target
= control target key end

     0   :  { %s1089_s15 = smov 0   ;;  %s1091_s16 = smov 0   ;;  %s1199_s0 = inlined_call_operand.vmem [shape: bf16[4,128,128], index: 0, kind: input, shape index: {}]   ;;  %s1200_s1 = inlined_call_operand.vmem [shape: bf16[4,128,128], index: 1, kind: input, shape index: {}]   ;;  %s1201_s2 = inlined_call_operand.vmem [shape: f32[4,128,128], index: 2, kind: output, shape index: {0}]   ;;  %s1202_s3 = inlined_call_operand.vmem [shape: f32[4,1,1,128], index: 3, kind: output, shape index: {1}]   ;;  %s1203_s4 = inlined_call_operand.vmem [shape: f32[4,1,1,128], index: 4, kind: output, shape index: {2}]  }
   0x1   :  { %s1093_s17 = smov 0  }
   0x2 LB: > { %s34_s18 = sadd.s32 1, %s1057_s16  ;;  %p914_p0 = scmp.ge.s32.totalorder %s1061_s17, 1  ;;  %s1061_s17 = sphi %s1093_s17, %s15_s17   ;;  %s1057_s16 = sphi %s1091_s16, %s1205_s16   ;;  %s1053_s15 = sphi %s1089_s15, %s1204_s15  }
   0x3   : > { %p36_p1 = scmp.ge.s32.totalorder %s34_s18, 4  ;;  %p221_p2 = scmp.lt.s32.totalorder %s1061_s17, 5 }
   0x5   : > { %s1207_s18 = smov (%p36_p1, %s34_s18), 0  ;;  %p222_p3 = pnand %p914_p0, %p221_p2 }
   0x6   : > { %p280_p4 = scmp.lt.s32.totalorder (!%p222_p3), %s1053_s15, 3  ;;  %v1063_v6 = vmov (!%p222_p3), 0  }
   0x7   : > { %225 = sbr.rel (%p222_p3) target bundleno = 310 (0x136), region = 28 }
   0xe   : > { %s1209_s15 = smov (!%p280_p4, %s1053_s15), 3 }
   0xf   : > { %s939_s19 = sshll.u32 %s1209_s15, 6  ;;  %s941_s26 = sshll.u32 %s1209_s15, 7 }
  0x10   : > { %s1113_s22 = scalar_lea.vmem %s1200_s1, %s939_s19  ;;  %s1121_s25 = scalar_lea.vmem %s1199_s0, %s939_s19 }
  0x11   : > { %v1031_v0 = vld [vmem:[%s1113_s22] sm:$0xff]   ;;  %v1032_v1 = vld [vmem:[%s1113_s22 + $0x8] sm:$0xff]   ;;  %v1033_v2 = vld [vmem:[%s1113_s22 + $0x10] sm:$0xff]   ;;  %s1164_s29 = scalar_lea.vmem %s1201_s2, %s941_s26  ;;  %s317_s6 = scalar_lea.vmem %s1202_s3, %s1209_s15 }
  0x12   : > { %958 = vmatprep.subr.bf16.mxu0 %v1031_v0  ;;  %990 = vmatprep.subr.bf16.mxu1 %v1031_v0  ;;  %v1034_v3 = vld [vmem:[%s1113_s22 + $0x18] sm:$0xff]   ;;  %v345_v4 = vld [vmem:[%s1121_s25] sm:$0xf]  ;;  %v346_v5 = vld [vmem:[%s1121_s25 + $0x4] sm:$0xf]  ;;  %s323_s9 = scalar_lea.vmem %s1203_s4, %s1209_s15 }
  0x13   : > { %959 = vmatpush3.bf16.msra.mxu0 %v1031_v0  ;;  %998 = vmatpush3.bf16.msra.mxu1 %v1031_v0  ;;  %v361_v7 = vmax.bf16 %v1063_v6, %v345_v4  ;;  %v362_v8 = vmax.bf16 %v1063_v6, %v346_v5  ;;  %v353_v9 = vld [vmem:[%s1121_s25 + $0x20] sm:$0xf]  ;;  %v354_v11 = vld [vmem:[%s1121_s25 + $0x24] sm:$0xf]  ;;  %v1036_v16 = vld [vmem:[%s1113_s22 + $0x28] sm:$0xff]  }
  0x14   : > { %960 = vmatprep.subr.bf16.mxu0 %v1032_v1  ;;  %991 = vmatprep.subr.bf16.mxu1 %v1032_v1  ;;  %v1035_v12 = vld [vmem:[%s1113_s22 + $0x20] sm:$0xff]   ;;  %v369_v13 = vmax.bf16 %v1063_v6, %v353_v9  ;;  %v370_v14 = vmax.bf16 %v1063_v6, %v354_v11  ;;  %v1037_v17 = vld [vmem:[%s1113_s22 + $0x30] sm:$0xff]   ;;  %v1038_v18 = vld [vmem:[%s1113_s22 + $0x38] sm:$0xff]  }
  0x15   : > { %v921_v10 = vcombine.low %v361_v7, %v362_v8  ;;  %v347_v19 = vld [vmem:[%s1121_s25 + $0x8] sm:$0xf]  ;;  %v348_v20 = vld [vmem:[%s1121_s25 + $0xc] sm:$0xf]  ;;  %v349_v21 = vld [vmem:[%s1121_s25 + $0x10] sm:$0xf] }
  0x16   : > { %v925_v15 = vcombine.low %v369_v13, %v370_v14  ;;  %v355_v22 = vld [vmem:[%s1121_s25 + $0x28] sm:$0xf]  ;;  %v356_v23 = vld [vmem:[%s1121_s25 + $0x2c] sm:$0xf]  ;;  %v350_v24 = vld [vmem:[%s1121_s25 + $0x14] sm:$0xf]  ;;  %v363_v27 = vmax.bf16 %v1063_v6, %v347_v19  ;;  %v364_v28 = vmax.bf16 %v1063_v6, %v348_v20  ;;  %v365_v29 = vmax.bf16 %v1063_v6, %v349_v21 }
  0x17   : > { %961 = vmatpush3.bf16.msra.mxu0 %v1032_v1  ;;  %999 = vmatpush3.bf16.msra.mxu1 %v1032_v1  ;;  %v357_v25 = vld [vmem:[%s1121_s25 + $0x30] sm:$0xf]  ;;  %v358_v26 = vld [vmem:[%s1121_s25 + $0x34] sm:$0xf]  ;;  %v371_v30 = vmax.bf16 %v1063_v6, %v355_v22  ;;  %v372_v31 = vmax.bf16 %v1063_v6, %v356_v23  ;;  %v366_v32 = vmax.bf16 %v1063_v6, %v350_v24  ;;  %v351_v36 = vld [vmem:[%s1121_s25 + $0x18] sm:$0xf] }
  0x18   : > { %962 = vmatprep.subr.bf16.mxu0 %v1033_v2  ;;  %992 = vmatprep.subr.bf16.mxu1 %v1033_v2  ;;  %v373_v33 = vmax.bf16 %v1063_v6, %v357_v25  ;;  %v374_v34 = vmax.bf16 %v1063_v6, %v358_v26  ;;  %v922_v35 = vcombine.low %v363_v27, %v364_v28  ;;  %v352_v39 = vld [vmem:[%s1121_s25 + $0x1c] sm:$0xf]  ;;  %v359_v41 = vld [vmem:[%s1121_s25 + $0x38] sm:$0xf] }
  0x19   : > { %974 = vmatprep.mubr.bf16.mxu0 %v921_v10  ;;  %982 = vmatprep.mubr.bf16.mxu1 %v925_v15  ;;  %v926_v37 = vcombine.low %v371_v30, %v372_v31  ;;  %v923_v38 = vcombine.low %v365_v29, %v366_v32  ;;  %v360_v42 = vld [vmem:[%s1121_s25 + $0x3c] sm:$0xf]  ;;  %v367_v43 = vmax.bf16 %v1063_v6, %v351_v36 }
  0x1a   : > { %v927_v40 = vcombine.low %v373_v33, %v374_v34  ;;  %v368_v44 = vmax.bf16 %v1063_v6, %v352_v39  ;;  %v375_v45 = vmax.bf16 %v1063_v6, %v359_v41  ;;  %v376_v46 = vmax.bf16 %v1063_v6, %v360_v42 }
  0x1b   : > { %963 = vmatpush3.bf16.msra.mxu0 %v1033_v2  ;;  %1000 = vmatpush3.bf16.msra.mxu1 %v1033_v2 }
  0x1c   : > { %964 = vmatprep.subr.bf16.mxu0 %v1034_v3  ;;  %993 = vmatprep.subr.bf16.mxu1 %v1034_v3  ;;  %v924_v47 = vcombine.low %v367_v43, %v368_v44  ;;  %v928_v48 = vcombine.low %v375_v45, %v376_v46 }
  0x1f   : > { %965 = vmatpush3.bf16.msra.mxu0 %v1034_v3  ;;  %1001 = vmatpush3.bf16.msra.mxu1 %v1034_v3 }
  0x20   : > { %966 = vmatprep.subr.bf16.mxu0 %v1035_v12  ;;  %994 = vmatprep.subr.bf16.mxu1 %v1035_v12 }
  0x23   : > { %967 = vmatpush3.bf16.msra.mxu0 %v1035_v12  ;;  %1002 = vmatpush3.bf16.msra.mxu1 %v1035_v12 }
  0x24   : > { %968 = vmatprep.subr.bf16.mxu0 %v1036_v16  ;;  %995 = vmatprep.subr.bf16.mxu1 %v1036_v16 }
  0x27   : > { %969 = vmatpush3.bf16.msra.mxu0 %v1036_v16  ;;  %1003 = vmatpush3.bf16.msra.mxu1 %v1036_v16 }
  0x28   : > { %970 = vmatprep.subr.bf16.mxu0 %v1037_v17  ;;  %996 = vmatprep.subr.bf16.mxu1 %v1037_v17 }
  0x2b   : > { %971 = vmatpush3.bf16.msra.mxu0 %v1037_v17  ;;  %1004 = vmatpush3.bf16.msra.mxu1 %v1037_v17 }
  0x2c   : > { %972 = vmatprep.subr.bf16.mxu0 %v1038_v18  ;;  %997 = vmatprep.subr.bf16.mxu1 %v1038_v18 }
  0x2f   : > { %973 = vmatpush3.bf16.msra.mxu0 %v1038_v18  ;;  %1005 = vmatpush3.bf16.msra.mxu1 %v1038_v18 }
  0x32   : > { %975 = vmatmul.mubr.bf16.vlgmr.msra.gmra.mrb[0].mxu0 %v922_v35  ;;  %983 = vmatmul.mubr.bf16.vlgmr.msra.gmra.mrb[0].mxu1 %v926_v37 }
  0x33   : > { %978 = vmatprep.mubr.bf16.mxu0 %v923_v38  ;;  %986 = vmatprep.mubr.bf16.mxu1 %v927_v40 }
  0x3a   : > { %979 = vmatmul.mubr.bf16.gmra.mrb[4].mxu0 %v924_v47  ;;  %987 = vmatmul.mubr.bf16.gmra.mrb[4].mxu1 %v928_v48 }
 0x105   : > { %v976_v49 = vpop.f32.mrb[0].mxu0  ;;  %v984_v50 = vpop.f32.mrb[0].mxu1 }
 0x106   : > { %655 = vst [vmem:[%s1164_s29 + $0x10] sm:$0xff] %v976_v49  ;;  %v539_v51 = vpop.f32.mrb[1].mxu0  ;;  %663 = vst [vmem:[%s1164_s29 + $0x50] sm:$0xff] %v984_v50  ;;  %v571_v52 = vpop.f32.mrb[1].mxu1  ;;  %v693_v60 = vmul.f32 %v976_v49, %v976_v49  ;;  %v701_v28 = vmul.f32 %v984_v50, %v984_v50 }
 0x107   : > { %653 = vst [vmem:[%s1164_s29] sm:$0xff] %v539_v51  ;;  %v977_v53 = vpop.f32.mrb[2].mxu0  ;;  %661 = vst [vmem:[%s1164_s29 + $0x40] sm:$0xff] %v571_v52  ;;  %v985_v54 = vpop.f32.mrb[2].mxu1  ;;  %v691_v57 = vmul.f32 %v539_v51, %v539_v51  ;;  %v699_v22 = vmul.f32 %v571_v52, %v571_v52 }
 0x108   : > { %656 = vst [vmem:[%s1164_s29 + $0x18] sm:$0xff] %v977_v53  ;;  %v542_v55 = vpop.f32.mrb[3].mxu0  ;;  %664 = vst [vmem:[%s1164_s29 + $0x58] sm:$0xff] %v985_v54  ;;  %v574_v56 = vpop.f32.mrb[3].mxu1  ;;  %v694_v63 = vmul.f32 %v977_v53, %v977_v53  ;;  %v702_v31 = vmul.f32 %v985_v54, %v985_v54 }
 0x109   : > { %654 = vst [vmem:[%s1164_s29 + $0x8] sm:$0xff] %v542_v55  ;;  %v669_v58 = vadd.f32 %v542_v55, %v539_v51  ;;  %v692_v59 = vmul.f32 %v542_v55, %v542_v55  ;;  %662 = vst [vmem:[%s1164_s29 + $0x48] sm:$0xff] %v574_v56  ;;  %v700_v27 = vmul.f32 %v574_v56, %v574_v56 }
 0x10b   : > { %v670_v61 = vadd.f32 %v976_v49, %v669_v58  ;;  %v707_v62 = vadd.f32 %v692_v59, %v691_v57 }
 0x10d   : > { %v708_v0 = vadd.f32 %v707_v62, %v693_v60  ;;  %v980_v1 = vpop.f32.mrb[4].mxu0  ;;  %v671_v2 = vadd.f32 %v977_v53, %v670_v61  ;;  %v988_v3 = vpop.f32.mrb[4].mxu1 }
 0x10e   : > { %659 = vst [vmem:[%s1164_s29 + $0x30] sm:$0xff] %v980_v1  ;;  %v555_v4 = vpop.f32.mrb[5].mxu0  ;;  %667 = vst [vmem:[%s1164_s29 + $0x70] sm:$0xff] %v988_v3  ;;  %v587_v5 = vpop.f32.mrb[5].mxu1  ;;  %v697_v16 = vmul.f32 %v980_v1, %v980_v1  ;;  %v705_v40 = vmul.f32 %v988_v3, %v988_v3 }
 0x10f   : > { %657 = vst [vmem:[%s1164_s29 + $0x20] sm:$0xff] %v555_v4  ;;  %v672_v6 = vadd.f32 %v671_v2, %v555_v4  ;;  %v695_v7 = vmul.f32 %v555_v4, %v555_v4  ;;  %v709_v8 = vadd.f32 %v708_v0, %v694_v63  ;;  %v981_v9 = vpop.f32.mrb[6].mxu0  ;;  %665 = vst [vmem:[%s1164_s29 + $0x60] sm:$0xff] %v587_v5  ;;  %v989_v10 = vpop.f32.mrb[6].mxu1 }
 0x110   : > { %660 = vst [vmem:[%s1164_s29 + $0x38] sm:$0xff] %v981_v9  ;;  %v558_v11 = vpop.f32.mrb[7].mxu0  ;;  %668 = vst [vmem:[%s1164_s29 + $0x78] sm:$0xff] %v989_v10  ;;  %v590_v12 = vpop.f32.mrb[7].mxu1  ;;  %v698_v19 = vmul.f32 %v981_v9, %v981_v9  ;;  %v703_v34 = vmul.f32 %v587_v5, %v587_v5  ;;  %v706_v43 = vmul.f32 %v989_v10, %v989_v10 }
 0x111   : > { %v710_v13 = vadd.f32 %v709_v8, %v695_v7  ;;  %658 = vst [vmem:[%s1164_s29 + $0x28] sm:$0xff] %v558_v11  ;;  %v673_v14 = vadd.f32 %v672_v6, %v558_v11  ;;  %v696_v15 = vmul.f32 %v558_v11, %v558_v11  ;;  %666 = vst [vmem:[%s1164_s29 + $0x68] sm:$0xff] %v590_v12 }
 0x112   : > { %v704_v39 = vmul.f32 %v590_v12, %v590_v12 }
 0x113   : > { %v674_v17 = vadd.f32 %v980_v1, %v673_v14  ;;  %v711_v18 = vadd.f32 %v710_v13, %v696_v15 }
 0x115   : > { %v712_v20 = vadd.f32 %v711_v18, %v697_v16  ;;  %v675_v21 = vadd.f32 %v981_v9, %v674_v17 }
 0x117   : > { %v676_v23 = vadd.f32 %v675_v21, %v571_v52  ;;  %v713_v24 = vadd.f32 %v712_v20, %v698_v19 }
 0x119   : > { %v714_v25 = vadd.f32 %v713_v24, %v699_v22  ;;  %v677_v26 = vadd.f32 %v676_v23, %v574_v56 }
 0x11b   : > { %v678_v29 = vadd.f32 %v984_v50, %v677_v26  ;;  %v715_v30 = vadd.f32 %v714_v25, %v700_v27 }
 0x11d   : > { %v716_v32 = vadd.f32 %v715_v30, %v701_v28  ;;  %v679_v33 = vadd.f32 %v985_v54, %v678_v29 }
 0x11f   : > { %v680_v35 = vadd.f32 %v679_v33, %v587_v5  ;;  %v717_v36 = vadd.f32 %v716_v32, %v702_v31 }
 0x121   : > { %v718_v37 = vadd.f32 %v717_v36, %v703_v34  ;;  %v681_v38 = vadd.f32 %v680_v35, %v590_v12 }
 0x123   : > { %v682_v41 = vadd.f32 %v988_v3, %v681_v38  ;;  %v719_v42 = vadd.f32 %v718_v37, %v704_v39 }
 0x125   : > { %v683_v44 = vadd.f32 %v989_v10, %v682_v41  ;;  %v720_v45 = vadd.f32 %v719_v42, %v705_v40 }
 0x127   : > { %v684_v46 = vrot.slane %v683_v44, 4  ;;  %v721_v47 = vadd.f32 %v720_v45, %v706_v43 }
 0x129   : > { %v685_v48 = vadd.f32 %v684_v46, %v683_v44  ;;  %v722_v49 = vrot.slane %v721_v47, 4 }
 0x12b   : > { %v686_v50 = vrot.slane %v685_v48, 2  ;;  %v723_v51 = vadd.f32 %v722_v49, %v721_v47 }
 0x12d   : > { %v687_v52 = vadd.f32 %v686_v50, %v685_v48  ;;  %v724_v53 = vrot.slane %v723_v51, 2 }
 0x12f   : > { %v688_v54 = vrot.slane %v687_v52, 1  ;;  %v725_v55 = vadd.f32 %v724_v53, %v723_v51 }
 0x131   : > { %v689_v56 = vadd.f32 %v688_v54, %v687_v52  ;;  %v726_v57 = vrot.slane %v725_v55, 1 }
 0x133   : > { %690 = vst [vmem:[%s317_s6] sm:$0x1] %v689_v56  ;;  %v727_v58 = vadd.f32 %v726_v57, %v725_v55 }
 0x135   : > { %728 = vst [vmem:[%s323_s9] sm:$0x1] %v727_v58 }
 0x136 PF: > { %s15_s17 = sadd.s32 1, %s1061_s17   ;;  %s1204_s15 = smov %s1057_s16 }
 0x137   : > { %p12_p5 = scmp.ge.s32.totalorder %s15_s17, 6   ;;  %s1205_s16 = smov %s1207_s18 }
 0x139   :  { %14 = sbr.rel (!%p12_p5) target bundleno = 2 (0x2), region = 93 }

</bundles_post_ra>
